<compile_context>
chip_gen: v6e
topology: v6e:2x2x1
jax: 0.10.0
libtpu: 0.0.40
codegen_flags: <defaults>
</compile_context>

<pallas_src>
import functools

import jax
import jax.numpy as jnp
from jax.experimental import pallas as pl
from jax.experimental.pallas import tpu as pltpu

LANES = 128


# ----------------------------------------------------------------------------
# Small static-K matmul on the VPU (unrolled broadcast-multiply-accumulate).
# ----------------------------------------------------------------------------
def _vpu_matmul(a, b):
    """(M, K) @ (K, N) with K a small static Python int; VALU slots only."""
    k_dim = a.shape[1]
    acc = a[:, 0:1] * b[0:1, :]
    for k in range(1, k_dim):
        acc = acc + a[:, k:k + 1] * b[k:k + 1, :]
    return acc


# ----------------------------------------------------------------------------
# One-time parameter preprocessing (hoisted OUT of the per-call forward).
# ----------------------------------------------------------------------------
def make_fused_params(w_enc, b_enc, w_dec, b_dec):
    w_fused = w_enc @ w_dec          # (F, F)
    b_hidden = b_enc @ w_dec         # (1, F)
    return w_fused, b_hidden, b_dec  # b_out = b_dec


def pad_params_to_lanes(w_fused, b_hidden, b_out, lanes=LANES):
    """Zero-pad the feature axis to 128 lanes (one-time; used by the tiled path)."""
    f_in, f_out = w_fused.shape
    w_pad = jnp.zeros((f_in, lanes), jnp.float32).at[:, :f_out].set(w_fused)
    bh_pad = jnp.zeros((1, lanes), jnp.float32).at[:, :f_out].set(b_hidden)
    bo_pad = jnp.zeros((1, lanes), jnp.float32).at[:, :f_out].set(b_out)
    return w_pad, bh_pad, bo_pad


# ----------------------------------------------------------------------------
# Exact-shape kernel for the module's tiny graph (N=3, F=3): grid-less, f32,
# everything whole-array resident in VMEM.  At this size the wall-clock is the
# custom-call launch; no in-kernel change matters (review item acknowledged).
# ----------------------------------------------------------------------------
def gae_small_kernel(a_ref, x_ref, w_ref, bh_ref, bo_ref, out_ref):
    a = a_ref[...]                                    # (N, N)
    xw = _vpu_matmul(x_ref[...], w_ref[...])          # (N, F)
    h = _vpu_matmul(a, xw) + bh_ref[...]              # (N, F)
    out_ref[...] = _vpu_matmul(a, h) + bo_ref[...]    # (N, F)


@jax.jit
def gae_forward_small(a_norm, x, w_fused, b_hidden, b_out):
    n, f = x.shape
    flops = 2 * n * f * f + 2 * (2 * n * n * f) + 2 * n * f
    bytes_accessed = 4 * (n * n + 4 * n * f + f * f + 2 * f)
    return pl.pallas_call(
        gae_small_kernel,
        out_shape=jax.ShapeDtypeStruct((n, f), jnp.float32),
        in_specs=[pl.BlockSpec(memory_space=pltpu.MemorySpace.VMEM)] * 5,
        out_specs=pl.BlockSpec(memory_space=pltpu.MemorySpace.VMEM),
        cost_estimate=pl.CostEstimate(
            flops=flops, transcendentals=0, bytes_accessed=bytes_accessed),
    )(a_norm, x, w_fused, b_hidden, b_out)


# ----------------------------------------------------------------------------
# Scaled row-tiled path (real graphs).  Two GCN propagation passes over A.
# ----------------------------------------------------------------------------
def _gcn_layer1_kernel(a_ref, x_ref, w_ref, b_ref, h_ref, acc_ref):
    """Row tile of  h = A @ (X @ W_fused) + b_hidden  (A bf16, MXU, f32 accum)."""
    k = pl.program_id(1)

    @pl.when(k == 0)
    def _():
        acc_ref[...] = jnp.zeros_like(acc_ref)

    # K = F = 3 contraction -> unrolled VPU broadcast-MAC (padded to 128 lanes
    # via the zero-padded W so the MXU result / accumulator is lane-dense).
    xw = _vpu_matmul(x_ref[...], w_ref[...])                     # (tile_k, 128) f32
    # K = tile_k contraction -> MXU, bf16 operands, f32 accumulation.
    acc_ref[...] += jnp.dot(a_ref[...], xw.astype(jnp.bfloat16),
                            preferred_element_type=jnp.float32)

    @pl.when(k == pl.num_programs(1) - 1)
    def _():
        h_ref[...] = (acc_ref[...] + b_ref[...]).astype(h_ref.dtype)


def _gcn_layer2_kernel(a_ref, h_ref, b_ref, o_ref, acc_ref):
    """Row tile of  recon = A @ h + b_out  (A, h bf16, MXU, f32 accum)."""
    k = pl.program_id(1)

    @pl.when(k == 0)
    def _():
        acc_ref[...] = jnp.zeros_like(acc_ref)

    acc_ref[...] += jnp.dot(a_ref[...], h_ref[...],
                            preferred_element_type=jnp.float32)

    @pl.when(k == pl.num_programs(1) - 1)
    def _():
        o_ref[...] = acc_ref[...] + b_ref[...]


@functools.partial(jax.jit, static_argnames=("tile_m", "tile_k"))
def gae_forward_tiled(a_bf16, x, w_pad, bh_pad, bo_pad, *, tile_m=128, tile_k=256):
    n, f_in = x.shape
    f_pad = w_pad.shape[1]                              # 128 (lane-dense)
    assert n % tile_m == 0 and n % tile_k == 0
    grid = (n // tile_m, n // tile_k)

    cp = pltpu.CompilerParams(
        dimension_semantics=("parallel", "arbitrary"),   # rows across TCs, k serial
        vmem_limit_bytes=32 * 1024 * 1024,               # fits v7x (64 MiB) and v5e/v6e
    )
    bytes_a_pass = 2 * n * n                             # one bf16 pass over A
    flops_pass = 2 * n * n * f_pad

    # -------- pass 1:  h = A @ (X @ W_fused) + b_hidden --------
    h = pl.pallas_call(
        _gcn_layer1_kernel,
        out_shape=jax.ShapeDtypeStruct((n, f_pad), jnp.bfloat16),
        grid_spec=pltpu.PrefetchScalarGridSpec(
            num_scalar_prefetch=0,
            grid=grid,
            in_specs=[
                pl.BlockSpec((tile_m, tile_k), lambda i, k: (i, k)),   # A block
                pl.BlockSpec((tile_k, f_in), lambda i, k: (k, 0)),     # X rows
                pl.BlockSpec((f_in, f_pad), lambda i, k: (0, 0)),      # W_fused (pad)
                pl.BlockSpec((1, f_pad), lambda i, k: (0, 0)),         # b_hidden (pad)
            ],
            out_specs=pl.BlockSpec((tile_m, f_pad), lambda i, k: (i, 0)),
            scratch_shapes=[pltpu.VMEM((tile_m, f_pad), jnp.float32)],
        ),
        compiler_params=cp,
        cost_estimate=pl.CostEstimate(
            flops=flops_pass + 2 * n * f_in * f_pad, transcendentals=0,
            bytes_accessed=bytes_a_pass + 4 * n * f_in + 2 * n * f_pad),
    )(a_bf16, x, w_pad, bh_pad)

    # -------- pass 2:  recon = A @ h + b_out --------
    recon_pad = pl.pallas_call(
        _gcn_layer2_kernel,
        out_shape=jax.ShapeDtypeStruct((n, f_pad), jnp.float32),
        grid_spec=pltpu.PrefetchScalarGridSpec(
            num_scalar_prefetch=0,
            grid=grid,
            in_specs=[
                pl.BlockSpec((tile_m, tile_k), lambda i, k: (i, k)),   # A block
                pl.BlockSpec((tile_k, f_pad), lambda i, k: (k, 0)),    # h rows (bf16)
                pl.BlockSpec((1, f_pad), lambda i, k: (0, 0)),         # b_out (pad)
            ],
            out_specs=pl.BlockSpec((tile_m, f_pad), lambda i, k: (i, 0)),
            scratch_shapes=[pltpu.VMEM((tile_m, f_pad), jnp.float32)],
        ),
        compiler_params=cp,
        cost_estimate=pl.CostEstimate(
            flops=flops_pass, transcendentals=0,
            bytes_accessed=bytes_a_pass + 2 * n * f_pad + 4 * n * f_pad),
    )(a_bf16, h, bo_pad)

    return recon_pad[:, :f_in]


# ----------------------------------------------------------------------------
# Glue: edge_index -> symmetrically-normalized dense adjacency with self-loops.
# Matches PyG gcn_norm for symmetric edge_index (the module's case); for directed
# / multi-edge inputs PyG's degree convention may differ (scatter-add duplicates).
# ----------------------------------------------------------------------------
def build_norm_adj(edge_index, num_nodes):
    src = edge_index[0]
    dst = edge_index[1]
    a = jnp.zeros((num_nodes, num_nodes), jnp.float32).at[dst, src].add(1.0)
    a = a + jnp.eye(num_nodes, dtype=jnp.float32)            # self-loops
    deg = jnp.sum(a, axis=1)
    d_inv_sqrt = jnp.where(deg > 0, 1.0 / jnp.sqrt(deg), 0.0)
    return d_inv_sqrt[:, None] * a * d_inv_sqrt[None, :]


# ----------------------------------------------------------------------------
# Pure-JAX references.
# ----------------------------------------------------------------------------
def reference_forward(x, a_norm, w_enc, b_enc, w_dec, b_dec):
    z = a_norm @ (x @ w_enc) + b_enc
    return a_norm @ (z @ w_dec) + b_dec


def reference_forward_mixed(x, a_bf16, w_fused, b_hidden, b_out):
    """Mimics the tiled kernel's bf16 casts (A, xw, h in bf16; f32 accumulation)."""
    a = a_bf16.astype(jnp.float32)
    xw = (x @ w_fused).astype(jnp.bfloat16).astype(jnp.float32)
    h = (a @ xw + b_hidden).astype(jnp.bfloat16).astype(jnp.float32)
    return a @ h + b_out


if __name__ == "__main__":
    # ---- Graph from the module definition: 3 nodes, 3 features, 4 directed edges.
    node_features = jnp.array(
        [[5.0, 3.0, 4.0],
         [5.0, 2.0, 2.0],
         [5.0, 1.0, 1.0]], dtype=jnp.float32)
    edge_index = jnp.array([[0, 1, 0, 2],
                            [1, 0, 2, 0]], dtype=jnp.int32)

    num_nodes, num_features = node_features.shape     # (3, 3)
    hidden = 16

    # Deterministic glorot-like init; shapes from GCNConv(3,16) / GCNConv(16,3).
    key = jax.random.PRNGKey(0)
    k1, k2 = jax.random.split(key)
    w_enc = jax.random.normal(k1, (num_features, hidden), jnp.float32) * (
        (2.0 / (num_features + hidden)) ** 0.5)
    b_enc = jnp.zeros((1, hidden), jnp.float32)
    w_dec = jax.random.normal(k2, (hidden, num_features), jnp.float32) * (
        (2.0 / (hidden + num_features)) ** 0.5)
    b_dec = jnp.zeros((1, num_features), jnp.float32)

    a_norm = build_norm_adj(edge_index, num_nodes)

    # One-time parameter fusion, hoisted out of the forward (review item 2).
    w_fused, b_hidden, b_out = make_fused_params(w_enc, b_enc, w_dec, b_dec)
    w_fused, b_hidden, b_out = jax.block_until_ready((w_fused, b_hidden, b_out))

    # ---- Small exact-shape path (the module's own forward).
    out = gae_forward_small(a_norm, node_features, w_fused, b_hidden, b_out)
    out = jax.block_until_ready(out)
    ref = reference_forward(node_features, a_norm, w_enc, b_enc, w_dec, b_dec)
    assert out.shape == (num_nodes, num_features)
    assert jnp.allclose(out, ref, atol=1e-4, rtol=1e-4), (out, ref)

    # ---- Scaled row-tiled path (the previously-TODO'd version) on a synthetic graph.
    n_big = 512
    kg1, kg2, kx = jax.random.split(jax.random.PRNGKey(1), 3)
    n_edges = 4096
    src = jax.random.randint(kg1, (n_edges,), 0, n_big)
    dst = jax.random.randint(kg2, (n_edges,), 0, n_big)
    edge_index_big = jnp.stack([src, dst]).astype(jnp.int32)
    x_big = jax.random.normal(kx, (n_big, num_features), jnp.float32)

    a_big = build_norm_adj(edge_index_big, n_big)
    a_big_bf16 = a_big.astype(jnp.bfloat16)            # bf16 halves the A traffic

    # One-time lane padding of the fused params (zero columns out to 128 lanes).
    w_pad, bh_pad, bo_pad = pad_params_to_lanes(w_fused, b_hidden, b_out)
    w_pad, bh_pad, bo_pad = jax.block_until_ready((w_pad, bh_pad, bo_pad))

    out_big = gae_forward_tiled(a_big_bf16, x_big, w_pad, bh_pad, bo_pad,
                                tile_m=128, tile_k=256)
    out_big = jax.block_until_ready(out_big)
    ref_big = reference_forward_mixed(x_big, a_big_bf16, w_fused, b_hidden, b_out)
    assert out_big.shape == (n_big, num_features)
    assert jnp.allclose(out_big, ref_big, rtol=2e-2, atol=2e-3), (
        jnp.max(jnp.abs(out_big - ref_big)))

    print("KERNEL_OK")
</pallas_src>

<mosaic_0001>
module attributes {stable_mosaic.version = 11 : i64} {
  func.func @gae_small_kernel(%arg0: memref<3x3xf32, #tpu.memory_space<vmem>>, %arg1: memref<3x3xf32, #tpu.memory_space<vmem>>, %arg2: memref<3x3xf32, #tpu.memory_space<vmem>>, %arg3: memref<1x3xf32, #tpu.memory_space<vmem>>, %arg4: memref<1x3xf32, #tpu.memory_space<vmem>>, %arg5: memref<3x3xf32, #tpu.memory_space<vmem>>) attributes {dimension_semantics = [], scalar_prefetch = 0 : i64, scratch_operands = 0 : i64, tpu.core_type = #tpu.core_type<tc>} {
    %c0 = arith.constant 0 : index
    %c0_0 = arith.constant 0 : index
    %0 = vector.load %arg0[%c0, %c0_0] : memref<3x3xf32, #tpu.memory_space<vmem>>, vector<3x3xf32>
    %c0_1 = arith.constant 0 : index
    %c0_2 = arith.constant 0 : index
    %1 = vector.load %arg1[%c0_1, %c0_2] : memref<3x3xf32, #tpu.memory_space<vmem>>, vector<3x3xf32>
    %c0_3 = arith.constant 0 : index
    %c0_4 = arith.constant 0 : index
    %2 = vector.load %arg2[%c0_3, %c0_4] : memref<3x3xf32, #tpu.memory_space<vmem>>, vector<3x3xf32>
    %3 = vector.extract_strided_slice %1 {offsets = [0, 0], sizes = [3, 1], strides = [1, 1]} : vector<3x3xf32> to vector<3x1xf32>
    %4 = vector.extract_strided_slice %2 {offsets = [0, 0], sizes = [1, 3], strides = [1, 1]} : vector<3x3xf32> to vector<1x3xf32>
    %5 = vector.broadcast %3 : vector<3x1xf32> to vector<3x3xf32>
    %6 = vector.broadcast %4 : vector<1x3xf32> to vector<3x3xf32>
    %7 = arith.mulf %5, %6 : vector<3x3xf32>
    %8 = vector.extract_strided_slice %1 {offsets = [0, 1], sizes = [3, 1], strides = [1, 1]} : vector<3x3xf32> to vector<3x1xf32>
    %9 = vector.extract_strided_slice %2 {offsets = [1, 0], sizes = [1, 3], strides = [1, 1]} : vector<3x3xf32> to vector<1x3xf32>
    %10 = vector.broadcast %8 : vector<3x1xf32> to vector<3x3xf32>
    %11 = vector.broadcast %9 : vector<1x3xf32> to vector<3x3xf32>
    %12 = arith.mulf %10, %11 : vector<3x3xf32>
    %13 = arith.addf %7, %12 : vector<3x3xf32>
    %14 = vector.extract_strided_slice %1 {offsets = [0, 2], sizes = [3, 1], strides = [1, 1]} : vector<3x3xf32> to vector<3x1xf32>
    %15 = vector.extract_strided_slice %2 {offsets = [2, 0], sizes = [1, 3], strides = [1, 1]} : vector<3x3xf32> to vector<1x3xf32>
    %16 = vector.broadcast %14 : vector<3x1xf32> to vector<3x3xf32>
    %17 = vector.broadcast %15 : vector<1x3xf32> to vector<3x3xf32>
    %18 = arith.mulf %16, %17 : vector<3x3xf32>
    %19 = arith.addf %13, %18 : vector<3x3xf32>
    %20 = vector.extract_strided_slice %0 {offsets = [0, 0], sizes = [3, 1], strides = [1, 1]} : vector<3x3xf32> to vector<3x1xf32>
    %21 = vector.extract_strided_slice %19 {offsets = [0, 0], sizes = [1, 3], strides = [1, 1]} : vector<3x3xf32> to vector<1x3xf32>
    %22 = vector.broadcast %20 : vector<3x1xf32> to vector<3x3xf32>
    %23 = vector.broadcast %21 : vector<1x3xf32> to vector<3x3xf32>
    %24 = arith.mulf %22, %23 : vector<3x3xf32>
    %25 = vector.extract_strided_slice %0 {offsets = [0, 1], sizes = [3, 1], strides = [1, 1]} : vector<3x3xf32> to vector<3x1xf32>
    %26 = vector.extract_strided_slice %19 {offsets = [1, 0], sizes = [1, 3], strides = [1, 1]} : vector<3x3xf32> to vector<1x3xf32>
    %27 = vector.broadcast %25 : vector<3x1xf32> to vector<3x3xf32>
    %28 = vector.broadcast %26 : vector<1x3xf32> to vector<3x3xf32>
    %29 = arith.mulf %27, %28 : vector<3x3xf32>
    %30 = arith.addf %24, %29 : vector<3x3xf32>
    %31 = vector.extract_strided_slice %0 {offsets = [0, 2], sizes = [3, 1], strides = [1, 1]} : vector<3x3xf32> to vector<3x1xf32>
    %32 = vector.extract_strided_slice %19 {offsets = [2, 0], sizes = [1, 3], strides = [1, 1]} : vector<3x3xf32> to vector<1x3xf32>
    %33 = vector.broadcast %31 : vector<3x1xf32> to vector<3x3xf32>
    %34 = vector.broadcast %32 : vector<1x3xf32> to vector<3x3xf32>
    %35 = arith.mulf %33, %34 : vector<3x3xf32>
    %36 = arith.addf %30, %35 : vector<3x3xf32>
    %c0_5 = arith.constant 0 : index
    %c0_6 = arith.constant 0 : index
    %37 = vector.load %arg3[%c0_5, %c0_6] : memref<1x3xf32, #tpu.memory_space<vmem>>, vector<1x3xf32>
    %38 = vector.broadcast %37 : vector<1x3xf32> to vector<3x3xf32>
    %39 = arith.addf %36, %38 : vector<3x3xf32>
    %40 = vector.extract_strided_slice %0 {offsets = [0, 0], sizes = [3, 1], strides = [1, 1]} : vector<3x3xf32> to vector<3x1xf32>
    %41 = vector.extract_strided_slice %39 {offsets = [0, 0], sizes = [1, 3], strides = [1, 1]} : vector<3x3xf32> to vector<1x3xf32>
    %42 = vector.broadcast %40 : vector<3x1xf32> to vector<3x3xf32>
    %43 = vector.broadcast %41 : vector<1x3xf32> to vector<3x3xf32>
    %44 = arith.mulf %42, %43 : vector<3x3xf32>
    %45 = vector.extract_strided_slice %0 {offsets = [0, 1], sizes = [3, 1], strides = [1, 1]} : vector<3x3xf32> to vector<3x1xf32>
    %46 = vector.extract_strided_slice %39 {offsets = [1, 0], sizes = [1, 3], strides = [1, 1]} : vector<3x3xf32> to vector<1x3xf32>
    %47 = vector.broadcast %45 : vector<3x1xf32> to vector<3x3xf32>
    %48 = vector.broadcast %46 : vector<1x3xf32> to vector<3x3xf32>
    %49 = arith.mulf %47, %48 : vector<3x3xf32>
    %50 = arith.addf %44, %49 : vector<3x3xf32>
    %51 = vector.extract_strided_slice %0 {offsets = [0, 2], sizes = [3, 1], strides = [1, 1]} : vector<3x3xf32> to vector<3x1xf32>
    %52 = vector.extract_strided_slice %39 {offsets = [2, 0], sizes = [1, 3], strides = [1, 1]} : vector<3x3xf32> to vector<1x3xf32>
    %53 = vector.broadcast %51 : vector<3x1xf32> to vector<3x3xf32>
    %54 = vector.broadcast %52 : vector<1x3xf32> to vector<3x3xf32>
    %55 = arith.mulf %53, %54 : vector<3x3xf32>
    %56 = arith.addf %50, %55 : vector<3x3xf32>
    %c0_7 = arith.constant 0 : index
    %c0_8 = arith.constant 0 : index
    %57 = vector.load %arg4[%c0_7, %c0_8] : memref<1x3xf32, #tpu.memory_space<vmem>>, vector<1x3xf32>
    %58 = vector.broadcast %57 : vector<1x3xf32> to vector<3x3xf32>
    %59 = arith.addf %56, %58 : vector<3x3xf32>
    %c0_9 = arith.constant 0 : index
    %c0_10 = arith.constant 0 : index
    %60 = vector.load %arg5[%c0_9, %c0_10] : memref<3x3xf32, #tpu.memory_space<vmem>>, vector<3x3xf32>
    tpu.vector_store %arg5[%c0_9, %c0_10], %59 {strides = array<i32>} : memref<3x3xf32, #tpu.memory_space<vmem>>, vector<3x3xf32>,
    return
  }
}

</mosaic_0001>

<bundles_post_ra>
// kernel: gae_forward_small.1
= control target key start
LH: loop header
LB: loop body
LE: loop exit
PB: predicated region body
PF: predicated region fallthrough
CT: control target
= control target key end

     0   :  { %10 = vsyncpa [#allocation3], 0  ;;  %s326_s0 = inlined_call_operand.hbm [shape: f32[3,3], index: 0, kind: input, shape index: {}]   ;;  %s327_s1 = inlined_call_operand.hbm [shape: f32[3,3], index: 1, kind: input, shape index: {}]   ;;  %s328_s2 = inlined_call_operand.hbm [shape: f32[3,3], index: 2, kind: input, shape index: {}]   ;;  %s329_s3 = inlined_call_operand.vmem [shape: f32[1,3], index: 3, kind: input, shape index: {}]   ;;  %s330_s4 = inlined_call_operand.vmem [shape: f32[1,3], index: 4, kind: input, shape index: {}]   ;;  %s331_s5 = inlined_call_operand.hbm [shape: f32[3,3], index: 5, kind: output, shape index: {}]  }
   0x1   :  { %11 = vsyncpa [#allocation6], 0 }
   0x2   :  { %12 = vsyncpa [#allocation4], 0  ;;  %s271_s18 = smov [#allocation5]   ;;  %s272_s20 = smov [#allocation2]  }
   0x3   :  { %s29_s19 = sshll.u32 %s271_s18, 4  ;;  %s19_s21 = sshll.u32 %s272_s20, 4  ;;  %s30_s19 = int_to_ptr.vmem [resolvable:$true] %s29_s19  ;;  %s20_s21 = int_to_ptr.vmem [resolvable:$true] %s19_s21 }
   0x4   :  { %s193_s22 = scalar_lea.vmem %s30_s19, 64  ;;  %p198_p1 = scmp.lt.s32.totalorder %s30_s19, %s30_s19 }
   0x5   :  { %p194_p0 = scmp.ne.s32.totalorder %s30_s19, %s193_s22  ;;  %p199_p2 = scmp.lt.s32.totalorder %s193_s22, %s193_s22 }
   0x7   :  { %p200_p3 = por %p199_p2, %p198_p1 }
   0x9   :  { %p201_p4 = pnand %p200_p3, %p194_p0 }
   0xb   :  { %204 = shalt.err (!%p201_p4)
}
   0xc   :  { %32 = dma.hbm_to_vmem [thread:$0]  %s327_s1, 64, %s30_s19, [#allocation6]  }
   0xd   :  { %s213_s25 = scalar_lea.vmem %s20_s21, 64  ;;  %p218_p6 = scmp.lt.s32.totalorder %s20_s21, %s20_s21 }
   0xe   :  { %p214_p5 = scmp.ne.s32.totalorder %s20_s21, %s213_s25  ;;  %p219_p7 = scmp.lt.s32.totalorder %s213_s25, %s213_s25 }
  0x10   :  { %p220_p8 = por %p219_p7, %p218_p6 }
  0x12   :  { %p221_p9 = pnand %p220_p8, %p214_p5 }
  0x14   :  { %224 = shalt.err (!%p221_p9)
}
  0x15   :  { %22 = dma.hbm_to_vmem [thread:$0]  %s326_s0, 64, %s20_s21, [#allocation3]  }
  0x16   :  { %s273_s28 = smov [#allocation7]  }
  0x17   :  { %s39_s29 = sshll.u32 %s273_s28, 4  ;;  %s40_s29 = int_to_ptr.vmem [resolvable:$true] %s39_s29 }
  0x18   :  { %s233_s30 = scalar_lea.vmem %s40_s29, 64  ;;  %p238_p11 = scmp.lt.s32.totalorder %s40_s29, %s40_s29 }
  0x19   :  { %p234_p10 = scmp.ne.s32.totalorder %s40_s29, %s233_s30  ;;  %p239_p12 = scmp.lt.s32.totalorder %s233_s30, %s233_s30 }
  0x1b   :  { %p240_p13 = por %p239_p12, %p238_p11 }
  0x1d   :  { %p241_p0 = pnand %p240_p13, %p234_p10 }
  0x1f   :  { %244 = shalt.err (!%p241_p0)
}
  0x20   :  { %42 = dma.hbm_to_vmem [thread:$0]  %s328_s2, 64, %s40_s29, [#allocation6]  }
  0x21   :  { %265 = dma.done.wait [#allocation3], 64  }
  0x22   :  { %266 = vsyncadd [#allocation3], 4294967232 }
  0x23   :  { %267 = dma.done.wait [#allocation6], 128  }
  0x24   :  { %268 = vsyncadd [#allocation6], 4294967168  ;;  %v274_v0 = vmov 0   ;;  %v275_v1 = vmov 2   ;;  %v57_v2 = vld [vmem:[#allocation5] sm:$0x7]  ;;  %v64_v5 = vlaneseq }
  0x25   :  { %179 = vset.pattern.permute.xlu0 %v274_v0  ;;  %181 = vset.pattern.permute.xlu1 %v275_v1  ;;  %v56_v3 = vld [vmem:[#allocation2] sm:$0x7]  ;;  %v276_v4 = vmov 1   ;;  %v58_v9 = vld [vmem:[#allocation7] sm:$0x7]  ;;  %s277_s9 = smov [#allocation8]  }
  0x26   :  { %61 = vperm.xlu0 %179, %v57_v2   ;;  %80 = vperm.xlu1 %181, %v57_v2   ;;  %v65_v6 = vshrl.u32 %v64_v5, 7  ;;  %v170_v32 = vld [vmem:[%s329_s3] ss:$0 sm:$0xff]  ;;  %s160_s10 = sshll.u32 %s277_s9, 4  ;;  %vm152_vm0 = vcmask 18432   ;;  %s161_s10 = int_to_ptr.vmem [resolvable:$true] %s160_s10 }
  0x27   :  { %v171_v42 = vld [vmem:[%s330_s4] ss:$0 sm:$0xff]  ;;  %s245_s3 = scalar_lea.vmem %s161_s10, 64  ;;  %p250_p2 = scmp.lt.s32.totalorder %s161_s10, %s161_s10 }
  0x28   :  { %v66_v7 = vsub.s32 0, %v65_v6  ;;  %v75_v8 = vsub.s32 1, %v65_v6  ;;  %v85_v11 = vsub.s32 2, %v65_v6  ;;  %p246_p1 = scmp.ne.s32.totalorder %s161_s10, %s245_s3  ;;  %p251_p3 = scmp.lt.s32.totalorder %s245_s3, %s245_s3 }
  0x2a   :  { %180 = vset.pattern.permute.xlu0 %v276_v4  ;;  %182 = vset.pattern.permute.xlu1 %v274_v0  ;;  %v67_v13 = vrot.slane %v58_v9, %v66_v7  ;;  %v76_v14 = vrot.slane %v58_v9, %v75_v8  ;;  %v86_v15 = vrot.slane %v58_v9, %v85_v11  ;;  %p252_p4 = por %p251_p3, %p250_p2 }
  0x2b   :  { %70 = vperm.xlu0 %180, %v57_v2   ;;  %91 = vperm.xlu1 %182, %v56_v3  }
  0x2c   :  { %p253_p5 = pnand %p252_p4, %p246_p1 }
  0x2f   :  { %184 = vset.pattern.permute.xlu0 %v275_v1  ;;  %183 = vset.pattern.permute.xlu1 %v276_v4 }
  0x30   :  { %110 = vperm.xlu0 %184, %v56_v3   ;;  %100 = vperm.xlu1 %183, %v56_v3  }
  0xa1   :  { %v62_v10 = vpop.permute.xlu0 %61  ;;  %v81_v12 = vpop.permute.xlu1 %80 }
  0xa2   :  { %v68_v18 = vmul.f32 %v67_v13, %v62_v10  ;;  %v87_v20 = vmul.f32 %v86_v15, %v81_v12 }
  0xa6   :  { %v71_v16 = vpop.permute.xlu0 %70  ;;  %v92_v17 = vpop.permute.xlu1 %91 }
  0xa7   :  { %v77_v19 = vmul.f32 %v76_v14, %v71_v16 }
  0xa9   :  { %v78_v21 = vadd.f32 %v77_v19, %v68_v18 }
  0xab   :  { %v88_v22 = vadd.f32 %v87_v20, %v78_v21  ;;  %v101_v23 = vpop.permute.xlu1 %100  ;;  %v111_v27 = vpop.permute.xlu0 %110 }
  0xad   :  { %v97_v24 = vrot.slane %v88_v22, %v66_v7  ;;  %v116_v25 = vrot.slane %v88_v22, %v85_v11  ;;  %v106_v26 = vrot.slane %v88_v22, %v75_v8 }
  0xaf   :  { %v98_v28 = vmul.f32 %v97_v24, %v92_v17  ;;  %v107_v29 = vmul.f32 %v106_v26, %v101_v23  ;;  %v117_v30 = vmul.f32 %v116_v25, %v111_v27 }
  0xb1   :  { %v108_v31 = vadd.f32 %v107_v29, %v98_v28 }
  0xb3   :  { %v118_v33 = vadd.f32 %v117_v30, %v108_v31 }
  0xb5   :  { %v126_v34 = vadd.f32 %v170_v32, %v118_v33 }
  0xb7   :  { %v130_v35 = vrot.slane %v126_v34, %v66_v7  ;;  %v135_v36 = vrot.slane %v126_v34, %v75_v8  ;;  %v141_v37 = vrot.slane %v126_v34, %v85_v11 }
  0xb9   :  { %v131_v38 = vmul.f32 %v130_v35, %v92_v17  ;;  %v136_v39 = vmul.f32 %v135_v36, %v101_v23  ;;  %v142_v41 = vmul.f32 %v141_v37, %v111_v27 }
  0xbb   :  { %v137_v40 = vadd.f32 %v136_v39, %v131_v38 }
  0xbd   :  { %v143_v43 = vadd.f32 %v142_v41, %v137_v40 }
  0xbf   :  { %v151_v44 = vadd.f32 %v171_v42, %v143_v43 }
  0xc1   :  { %153 = vst.msk [vmem:[#allocation8] sm:$0x7] %vm152_vm0, %v151_v44 }
  0xc2   :  { %256 = shalt.err (!%p253_p5)
}
  0xc3   :  { %163 = dma.vmem_to_hbm [thread:$0]  %s161_s10, 64, %s331_s5, [#allocation4]  }
  0xc4   :  { %269 = dma.done.wait [#allocation4], 64  }
  0xc5   :  { %270 = vsyncadd [#allocation4], 4294967232 }
  0xc6   :  { %167 = vsyncpa [#allocation3], 1 }
  0xc7   :  { %168 = vsyncpa [#allocation6], 1 }
  0xc8   :  { %169 = vsyncpa [#allocation4], 1 }

</bundles_post_ra>
